<compile_context>
chip_gen: v7x
topology: tpu7x:2x2x1
jax: 0.10.0
libtpu: 0.0.40
codegen_flags: <defaults>
</compile_context>

<pallas_src>
import math
import functools

import jax
import jax.numpy as jnp
from jax.experimental import pallas as pl
from jax.experimental.pallas import tpu as pltpu

_INV_SQRT2 = 1.0 / math.sqrt(2.0)
_SQRT_2_OVER_PI = math.sqrt(2.0 / math.pi)


def _round_up(x, m):
    return ((x + m - 1) // m) * m


def _cdiv(a, b):
    return -(-a // b)


def _vmem_capacity_bytes():
    try:
        return int(pltpu.get_tpu_info().vmem_capacity_bytes)
    except Exception:
        return 64 * 1024 * 1024  # conservative fallback (v7x per-TC VMEM)


def _transform_kernel(x_ref, w_ref, b_ref, gamma_ref, beta_ref, o_ref, *,
                      eps, approx_gelu):
    # x_ref:     (tm, H)  tile of input rows (native dtype)
    # w_ref:     (H, H)   dense weight, pre-transposed, compute dtype (bf16 default)
    # b_ref:     (1, H)   dense bias   (f32)
    # gamma_ref: (1, H)   LN weight    (f32)
    # beta_ref:  (1, H)   LN bias      (f32)

    # Cast the activation tile to the weight's compute dtype so the MXU runs the
    # low-precision path (no-op if dtypes already match); accumulate in f32.
    x = x_ref[...].astype(w_ref.dtype)
    h = jnp.dot(x, w_ref[...], preferred_element_type=jnp.float32)
    h = h + b_ref[...]

    if approx_gelu:
        # tanh-approx GELU: transcendental goes to the EUP slot (off the VALU
        # critical path).  Opt-in only -- torch default is exact erf.
        inner = _SQRT_2_OVER_PI * (h + 0.044715 * (h * h * h))
        h = 0.5 * h * (1.0 + jnp.tanh(inner))
    else:
        # Exact erf-based GELU (matches torch.nn.functional.gelu default).
        h = 0.5 * h * (1.0 + jax.lax.erf(h * _INV_SQRT2))

    # LayerNorm over H, fused one-pass statistics: var = E[h^2] - mean^2.
    mean = jnp.mean(h, axis=-1, keepdims=True)
    mean_sq = jnp.mean(h * h, axis=-1, keepdims=True)
    var = jnp.maximum(mean_sq - mean * mean, 0.0)
    inv_std = jax.lax.rsqrt(var + eps)

    # Folded affine epilogue: out = h * scale + shift.
    scale = gamma_ref[...] * inv_std
    shift = beta_ref[...] - mean * scale
    o_ref[...] = (h * scale + shift).astype(o_ref.dtype)


def prepare_params(dense_w, dense_b, ln_w, ln_b, *, compute_dtype=jnp.bfloat16):
    """One-time parameter preparation (outside the hot path).

    dense_w is in PyTorch nn.Linear layout (out, in); transpose so the kernel
    computes x @ w.  The weight is cast to the matmul compute dtype (bf16 by
    default -- this is what selects the fast MXU path; pass jnp.float32 for
    bit-faithful f32 numerics).  Bias / LN params are cast to f32 once.
    """
    # TODO(synk): optional fp8 weight quantization for v7x (MXU fp8 path) behind a flag.
    H = dense_w.shape[0]
    w_t = dense_w.T
    if compute_dtype is not None:
        w_t = w_t.astype(compute_dtype)
    b2d = dense_b.astype(jnp.float32).reshape(1, H)
    gamma2d = ln_w.astype(jnp.float32).reshape(1, H)
    beta2d = ln_b.astype(jnp.float32).reshape(1, H)
    return w_t, b2d, gamma2d, beta2d


def _pick_tile_and_vmem(N, H, x_bytes, o_bytes, w_bytes, tm):
    cap = _vmem_capacity_bytes()
    budget = int(0.75 * cap)

    if tm is None:
        # v5e/v6e (128 MiB VMEM): big row tiles; v7x (64 MiB): cap at 1024.
        tm = 2048 if cap >= 100 * 1024 * 1024 else 1024

    # At least 2 grid steps when N allows so both v7x TCs get work under
    # dimension_semantics=("parallel",); clamp to a multiple of 8 (sublane).
    tm_eff = min(tm, max(8, _round_up(_cdiv(N, 2), 8)))
    tm_eff = max(8, (tm_eff // 8) * 8)

    def need(t):
        return (2 * t * H * x_bytes        # x tiles (double buffered)
                + 2 * t * H * o_bytes      # out tiles (double buffered)
                + H * H * w_bytes          # resident weight (single buffered)
                + 3 * H * 4                # bias / gamma / beta (single buffered)
                + 4 * t * H * 4)           # in-kernel f32 temporaries (h, scale, shift, slack)

    while tm_eff > 8 and need(tm_eff) > budget:
        tm_eff = max(8, ((tm_eff // 2) // 8) * 8)

    vmem_limit = int(min(budget, max(int(1.25 * need(tm_eff)), 8 * 1024 * 1024)))
    return tm_eff, vmem_limit


def bert_prediction_head_transform(hidden_states, w_t, b2d, gamma2d, beta2d,
                                   *, eps=1e-12, tm=None, approx_gelu=False):
    """hidden_states: [..., H]; params from prepare_params()."""
    orig_shape = hidden_states.shape
    H = orig_shape[-1]
    x2d = hidden_states.reshape(-1, H)
    N = x2d.shape[0]

    # Only pad if there are fewer than 8 rows total (sublane minimum); ragged
    # last blocks are otherwise handled by Pallas masking, no wrapper copy.
    N_run = N
    if N < 8:
        x2d = jnp.pad(x2d, ((0, 8 - N), (0, 0)))
        N_run = 8

    x_bytes = jnp.dtype(hidden_states.dtype).itemsize
    o_bytes = x_bytes
    w_bytes = jnp.dtype(w_t.dtype).itemsize

    tm_eff, vmem_limit = _pick_tile_and_vmem(N_run, H, x_bytes, o_bytes, w_bytes, tm)
    grid = (_cdiv(N_run, tm_eff),)

    cost = pl.CostEstimate(
        flops=2 * N_run * H * H,
        transcendentals=N_run * H,
        bytes_accessed=(N_run * H * x_bytes + N_run * H * o_bytes
                        + H * H * w_bytes + 3 * H * 4),
    )

    kernel = functools.partial(_transform_kernel, eps=eps, approx_gelu=approx_gelu)

    out = pl.pallas_call(
        kernel,
        out_shape=jax.ShapeDtypeStruct((N_run, H), hidden_states.dtype),
        grid_spec=pltpu.PrefetchScalarGridSpec(
            num_scalar_prefetch=0,
            grid=grid,
            in_specs=[
                pl.BlockSpec((tm_eff, H), lambda i: (i, 0)),           # x rows (streamed)
                pl.BlockSpec((H, H), lambda i: (0, 0),
                             pipeline_mode=pl.Buffered(1)),            # weight (resident)
                pl.BlockSpec((1, H), lambda i: (0, 0),
                             pipeline_mode=pl.Buffered(1)),            # dense bias
                pl.BlockSpec((1, H), lambda i: (0, 0),
                             pipeline_mode=pl.Buffered(1)),            # LN gamma
                pl.BlockSpec((1, H), lambda i: (0, 0),
                             pipeline_mode=pl.Buffered(1)),            # LN beta
            ],
            out_specs=pl.BlockSpec((tm_eff, H), lambda i: (i, 0)),
        ),
        compiler_params=pltpu.CompilerParams(
            dimension_semantics=("parallel",),   # shards row tiles across v7x's 2 TCs
            vmem_limit_bytes=vmem_limit,
        ),
        cost_estimate=cost,
    )(x2d, w_t, b2d, gamma2d, beta2d)

    if N_run != N:
        out = out[:N]
    return out.reshape(orig_shape)


def _reference(hidden_states, dense_w, dense_b, ln_w, ln_b, eps=1e-12):
    h = hidden_states @ dense_w.T + dense_b
    h = 0.5 * h * (1.0 + jax.lax.erf(h / jnp.sqrt(2.0).astype(h.dtype)))
    mean = jnp.mean(h, axis=-1, keepdims=True)
    var = jnp.mean((h - mean) ** 2, axis=-1, keepdims=True)
    return (h - mean) / jnp.sqrt(var + eps) * ln_w + ln_b


if __name__ == "__main__":
    # --- test 1: small BERT-like shapes (batch=2, seq=8, hidden=32), f32 path --
    B, S, H = 2, 8, 32
    key = jax.random.PRNGKey(0)
    k_x, k_w, k_b, k_g, k_be = jax.random.split(key, 5)

    x = jax.random.normal(k_x, (B, S, H), dtype=jnp.float32)
    dense_w = jax.random.normal(k_w, (H, H), dtype=jnp.float32) * (1.0 / math.sqrt(H))
    dense_b = jax.random.normal(k_b, (H,), dtype=jnp.float32) * 0.02
    ln_w = 1.0 + 0.1 * jax.random.normal(k_g, (H,), dtype=jnp.float32)
    ln_b = 0.1 * jax.random.normal(k_be, (H,), dtype=jnp.float32)

    ref = _reference(x, dense_w, dense_b, ln_w, ln_b)

    params_f32 = prepare_params(dense_w, dense_b, ln_w, ln_b,
                                compute_dtype=jnp.float32)
    out = jax.block_until_ready(bert_prediction_head_transform(x, *params_f32))
    assert out.shape == x.shape
    assert jnp.allclose(out, ref, atol=1e-4, rtol=1e-4), "mismatch vs reference (test 1, f32)"

    # --- test 2: ragged row count N=15 (exercises masked last block), f32 path --
    B2, S2, H2 = 3, 5, 128
    ks = jax.random.split(jax.random.PRNGKey(1), 5)
    x2 = jax.random.normal(ks[0], (B2, S2, H2), dtype=jnp.float32)
    w2 = jax.random.normal(ks[1], (H2, H2), dtype=jnp.float32) * (1.0 / math.sqrt(H2))
    b2 = jax.random.normal(ks[2], (H2,), dtype=jnp.float32) * 0.02
    g2 = 1.0 + 0.1 * jax.random.normal(ks[3], (H2,), dtype=jnp.float32)
    be2 = 0.1 * jax.random.normal(ks[4], (H2,), dtype=jnp.float32)

    params2 = prepare_params(w2, b2, g2, be2, compute_dtype=jnp.float32)
    out2 = jax.block_until_ready(bert_prediction_head_transform(x2, *params2))
    ref2 = _reference(x2, w2, b2, g2, be2)
    assert out2.shape == x2.shape
    assert jnp.allclose(out2, ref2, atol=1e-4, rtol=1e-4), "mismatch vs reference (test 2, ragged)"

    # --- test 3: default fast path (bf16 MXU operands, f32 accumulation) --------
    params_bf16 = prepare_params(dense_w, dense_b, ln_w, ln_b)  # compute_dtype=bf16 default
    out3 = jax.block_until_ready(bert_prediction_head_transform(x, *params_bf16))
    assert out3.shape == x.shape
    assert jnp.allclose(out3, ref, atol=5e-2, rtol=5e-2), "mismatch vs reference (test 3, bf16)"

    print("KERNEL_OK")
</pallas_src>

<mosaic_0001>
module attributes {stable_mosaic.version = 11 : i64} {
  func.func @_transform_kernel(%arg0: i32, %arg1: memref<8x32xf32, #tpu.memory_space<vmem>>, %arg2: memref<32x32xf32, #tpu.memory_space<vmem>>, %arg3: memref<1x32xf32, #tpu.memory_space<vmem>>, %arg4: memref<1x32xf32, #tpu.memory_space<vmem>>, %arg5: memref<1x32xf32, #tpu.memory_space<vmem>>, %arg6: memref<8x32xf32, #tpu.memory_space<vmem>>) attributes {dimension_semantics = [#tpu.dimension_semantics<parallel>], iteration_bounds = array<i64: 2>, scalar_prefetch = 0 : i64, scratch_operands = 0 : i64, tpu.core_type = #tpu.core_type<tc>, window_params = [{transform_indices = @transform_0, window_bounds = array<i64: 8, 32>}, {pipeline_mode = #tpu.pipeline_mode<synchronous>, transform_indices = @transform_1, window_bounds = array<i64: 32, 32>}, {pipeline_mode = #tpu.pipeline_mode<synchronous>, transform_indices = @transform_2, window_bounds = array<i64: 1, 32>}, {pipeline_mode = #tpu.pipeline_mode<synchronous>, transform_indices = @transform_3, window_bounds = array<i64: 1, 32>}, {pipeline_mode = #tpu.pipeline_mode<synchronous>, transform_indices = @transform_4, window_bounds = array<i64: 1, 32>}, {transform_indices = @transform_5, window_bounds = array<i64: 8, 32>}]} {
    %c0 = arith.constant 0 : index
    %c0_0 = arith.constant 0 : index
    %0 = vector.load %arg1[%c0, %c0_0] : memref<8x32xf32, #tpu.memory_space<vmem>>, vector<8x32xf32>
    %c0_1 = arith.constant 0 : index
    %c0_2 = arith.constant 0 : index
    %1 = vector.load %arg2[%c0_1, %c0_2] : memref<32x32xf32, #tpu.memory_space<vmem>>, vector<32x32xf32>
    %cst = arith.constant dense<0.000000e+00> : vector<8x32xf32>
    %2 = tpu.matmul %0, %1, %cst {dimension_numbers = #tpu.dot_dimension_numbers<[1], [0], [0], [1], [0, 0, 1, 1], [], []>} : vector<8x32xf32>, vector<32x32xf32>, vector<8x32xf32> -> vector<8x32xf32>
    %c0_3 = arith.constant 0 : index
    %c0_4 = arith.constant 0 : index
    %3 = vector.load %arg3[%c0_3, %c0_4] : memref<1x32xf32, #tpu.memory_space<vmem>>, vector<1x32xf32>
    %4 = vector.broadcast %3 : vector<1x32xf32> to vector<8x32xf32>
    %5 = arith.addf %2, %4 : vector<8x32xf32>
    %cst_5 = arith.constant 5.000000e-01 : f32
    %6 = vector.broadcast %cst_5 : f32 to vector<8x32xf32>
    %7 = arith.mulf %6, %5 : vector<8x32xf32>
    %cst_6 = arith.constant 0.707106769 : f32
    %8 = vector.broadcast %cst_6 : f32 to vector<8x32xf32>
    %9 = arith.mulf %5, %8 : vector<8x32xf32>
    %10 = math.erf %9 : vector<8x32xf32>
    %cst_7 = arith.constant 1.000000e+00 : f32
    %11 = vector.broadcast %cst_7 : f32 to vector<8x32xf32>
    %12 = arith.addf %11, %10 : vector<8x32xf32>
    %13 = arith.mulf %7, %12 : vector<8x32xf32>
    %cst_8 = arith.constant dense<0.000000e+00> : vector<8xf32>
    %14 = vector.multi_reduction <add>, %13, %cst_8 [1] : vector<8x32xf32> to vector<8xf32>
    %15 = vector.shape_cast %14 : vector<8xf32> to vector<8x1xf32>
    %cst_9 = arith.constant 3.200000e+01 : f32
    %16 = vector.broadcast %cst_9 : f32 to vector<8x1xf32>
    %17 = arith.divf %15, %16 : vector<8x1xf32>
    %18 = arith.mulf %13, %13 : vector<8x32xf32>
    %cst_10 = arith.constant dense<0.000000e+00> : vector<8xf32>
    %19 = vector.multi_reduction <add>, %18, %cst_10 [1] : vector<8x32xf32> to vector<8xf32>
    %20 = vector.shape_cast %19 : vector<8xf32> to vector<8x1xf32>
    %cst_11 = arith.constant 3.200000e+01 : f32
    %21 = vector.broadcast %cst_11 : f32 to vector<8x1xf32>
    %22 = arith.divf %20, %21 : vector<8x1xf32>
    %23 = arith.mulf %17, %17 : vector<8x1xf32>
    %24 = arith.subf %22, %23 : vector<8x1xf32>
    %cst_12 = arith.constant 0.000000e+00 : f32
    %25 = vector.broadcast %cst_12 : f32 to vector<8x1xf32>
    %26 = arith.maximumf %24, %25 : vector<8x1xf32>
    %cst_13 = arith.constant 9.99999996E-13 : f32
    %27 = vector.broadcast %cst_13 : f32 to vector<8x1xf32>
    %28 = arith.addf %26, %27 : vector<8x1xf32>
    %29 = math.rsqrt %28 : vector<8x1xf32>
    %c0_14 = arith.constant 0 : index
    %c0_15 = arith.constant 0 : index
    %30 = vector.load %arg4[%c0_14, %c0_15] : memref<1x32xf32, #tpu.memory_space<vmem>>, vector<1x32xf32>
    %31 = vector.broadcast %30 : vector<1x32xf32> to vector<8x32xf32>
    %32 = vector.broadcast %29 : vector<8x1xf32> to vector<8x32xf32>
    %33 = arith.mulf %31, %32 : vector<8x32xf32>
    %c0_16 = arith.constant 0 : index
    %c0_17 = arith.constant 0 : index
    %34 = vector.load %arg5[%c0_16, %c0_17] : memref<1x32xf32, #tpu.memory_space<vmem>>, vector<1x32xf32>
    %35 = vector.broadcast %17 : vector<8x1xf32> to vector<8x32xf32>
    %36 = arith.mulf %35, %33 : vector<8x32xf32>
    %37 = vector.broadcast %34 : vector<1x32xf32> to vector<8x32xf32>
    %38 = arith.subf %37, %36 : vector<8x32xf32>
    %39 = arith.mulf %13, %33 : vector<8x32xf32>
    %40 = arith.addf %39, %38 : vector<8x32xf32>
    %c0_18 = arith.constant 0 : index
    %c0_19 = arith.constant 0 : index
    %41 = vector.load %arg6[%c0_18, %c0_19] : memref<8x32xf32, #tpu.memory_space<vmem>>, vector<8x32xf32>
    tpu.vector_store %arg6[%c0_18, %c0_19], %40 {strides = array<i32>} : memref<8x32xf32, #tpu.memory_space<vmem>>, vector<8x32xf32>,
    return
  }
  func.func @transform_0(%arg0: i32) -> (i32, i32) {
    %c0_i32 = arith.constant 0 : i32
    %c0_i32_0 = arith.constant 0 : i32
    return %arg0, %c0_i32 : i32, i32
  }
  func.func @transform_1(%arg0: i32) -> (i32, i32) {
    %c0_i32 = arith.constant 0 : i32
    %c0_i32_0 = arith.constant 0 : i32
    %c0_i32_1 = arith.constant 0 : i32
    return %c0_i32, %c0_i32_0 : i32, i32
  }
  func.func @transform_2(%arg0: i32) -> (i32, i32) {
    %c0_i32 = arith.constant 0 : i32
    %c0_i32_0 = arith.constant 0 : i32
    %c0_i32_1 = arith.constant 0 : i32
    return %c0_i32, %c0_i32_0 : i32, i32
  }
  func.func @transform_3(%arg0: i32) -> (i32, i32) {
    %c0_i32 = arith.constant 0 : i32
    %c0_i32_0 = arith.constant 0 : i32
    %c0_i32_1 = arith.constant 0 : i32
    return %c0_i32, %c0_i32_0 : i32, i32
  }
  func.func @transform_4(%arg0: i32) -> (i32, i32) {
    %c0_i32 = arith.constant 0 : i32
    %c0_i32_0 = arith.constant 0 : i32
    %c0_i32_1 = arith.constant 0 : i32
    return %c0_i32, %c0_i32_0 : i32, i32
  }
  func.func @transform_5(%arg0: i32) -> (i32, i32) {
    %c0_i32 = arith.constant 0 : i32
    %c0_i32_0 = arith.constant 0 : i32
    return %arg0, %c0_i32 : i32, i32
  }
}

</mosaic_0001>

<bundles_post_ra>
// kernel: tpu_custom_call.1
= control target key start
LH: loop header
LB: loop body
LE: loop exit
PB: predicated region body
PF: predicated region fallthrough
CT: control target
= control target key end

     0   :  { %10 = vsyncpa [#allocation3], 0  ;;  %s962_s0 = inlined_call_operand.hbm [shape: f32[16,32], index: 0, kind: input, shape index: {}]   ;;  %s963_s1 = inlined_call_operand.hbm [shape: f32[32,32], index: 1, kind: input, shape index: {}]   ;;  %s964_s2 = inlined_call_operand.vmem [shape: f32[1,32], index: 2, kind: input, shape index: {}]   ;;  %s965_s3 = inlined_call_operand.vmem [shape: f32[1,32], index: 3, kind: input, shape index: {}]   ;;  %s966_s4 = inlined_call_operand.vmem [shape: f32[1,32], index: 4, kind: input, shape index: {}]   ;;  %s967_s5 = inlined_call_operand.hbm [shape: f32[16,32], index: 5, kind: output, shape index: {}]  }
   0x1   :  { %12 = vsyncpa [#allocation3 + $0x1], 0 }
   0x2   :  { %13 = vsyncpa [#allocation6], 0 }
   0x3   :  { %14 = vsyncpa [#allocation4], 0 }
   0x4   :  { %16 = vsyncpa [#allocation4 + $0x1], 0  ;;  %s749_s18 = smov 0   ;;  %s751_s19 = smov 0  }
   0x5   :  { %s753_s20 = smov 0   ;;  %s755_s21 = smov 0  }
   0x6 LB: > { %s770_s22 = sadd.s32 4294967295, %s709_s21   ;;  %s475_s23 = sadd.s32 4294967294, %s709_s21   ;;  %s709_s21 = sphi %s755_s21, %s987_s21   ;;  %s705_s20 = sphi %s753_s20, %s986_s20   ;;  %s701_s19 = sphi %s751_s19, %s985_s19   ;;  %s697_s18 = sphi %s749_s18, %s984_s18  }
   0x7   : > { %p42_p0 = scmp.ne.s32.totalorder %s701_s19, %s697_s18  ;;  %p968_p1 = scmp.eq.s32.totalorder %s770_s22, 0 }
   0x8   : > { %p156_p3 = scmp.eq.s32.totalorder %s475_s23, 1  ;;  %p476_p5 = scmp.ge.s32.totalorder %s709_s21, 1 }
   0x9   : > { %p779_p4 = por %p968_p1, %p42_p0  ;;  %p163_p7 = scmp.lt.s32.totalorder %s709_s21, 3 }
   0xa   : > { %p784_p6 = por %p156_p3, %p42_p0  ;;  %s711_s27 = smov [#allocation5]  }
   0xb   : > { %s971_s24 = scalar_select %p779_p4, 1, 0 }
   0xc   : > { %s972_s25 = scalar_select %p784_p6, 1, 0 }
   0xd   : > { %p789_p8 = pnand %p476_p5, %p163_p7  ;;  %s175_s28 = sshll.u32 %s711_s27, 4  ;;  %s793_s28 = int_to_ptr.vmem [resolvable:$true] %s175_s28 }
   0xe   : > { %s805_s30 = sadd.s32 1, %s709_s21   ;;  %s29_s6 = sadd.s32 1, %s705_s20 }
   0xf   : > { %s973_s26 = scalar_select %p789_p8, 1, 0 }
  0x10   : > { %p523_p9 = pneg %p789_p8  ;;  %s26_s7 = ssub.s32 %s709_s21, %s805_s30 }
  0x11   : > { %s581_s10 = scalar_lea.hbm %s963_s1, 512 }
  0x12   : > { %p800_p11 = pnand %p523_p9, %p968_p1  ;;  %p582_p12 = scmp.ne.s32.totalorder %s963_s1, %s581_s10 }
  0x13   : > { %p588_p5 = scmp.lt.u32.totalorder %s581_s10, %s963_s1 }
  0x14   : > { %p583_p13 = pneg %p800_p11 }
  0x16   : > { %p584_p0 = pnand %p583_p13, %p582_p12 }
  0x18   : > { %p585_p3 = pneg %p584_p0 }
  0x1a   : > { %p590_p7 = pnand %p588_p5, %p585_p3 }
  0x1c   : > { %593 = shalt.err (!%p590_p7)
}
  0x1d   : > { %s594_s15 = scalar_lea.vmem %s793_s28, 512  ;;  %p602_p2 = scmp.lt.s32.totalorder %s793_s28, %s793_s28 }
  0x1e   : > { %p595_p9 = scmp.ne.s32.totalorder %s793_s28, %s594_s15  ;;  %p603_p6 = scmp.lt.s32.totalorder %s594_s15, %s594_s15 }
  0x20   : > { %p597_p10 = pnand %p595_p9, %p583_p13  ;;  %p604_p4 = por %p603_p6, %p602_p2 }
  0x22   : > { %p598_p1 = pneg %p597_p10 }
  0x24   : > { %p605_p8 = pnand %p604_p4, %p598_p1 }
  0x26   : > { %608 = shalt.err (!%p605_p8)
}
  0x27   : > { %s712_s16 = smov 128   ;;  %s713_s17 = smov 8  }
  0x28   : > { %526 = dma.hbm_to_vmem [thread:$0]  (!%p800_p11), %s963_s1, 512, %s793_s28, [#allocation6], %s712_s16, %s712_s16, %s713_s17  }
  0x29   : > { %p27_p2 = scmp.eq.s32.totalorder %s26_s7, 0  ;;  %p36_p1 = scmp.ne.s32.totalorder %s705_s20, %s701_s19 }
  0x2a   : > { %p37_p4 = scmp.eq.s32.totalorder %s709_s21, 0  ;;  %p536_p6 = scmp.lt.s32.totalorder %s709_s21, 2 }
  0x2b   : > { %s836_s8 = scalar_select %p27_p2, %s705_s20, %s29_s6  }
  0x2c   : > { %p38_p8 = por %p37_p4, %p36_p1  ;;  %p975_p10 = scmp.eq.s32.totalorder %s770_s22, 1 }
  0x2d   : > { %s198_s10 = sand.u32 1, %s705_s20   ;;  %s480_s11 = sshll.u32 %s709_s21, 7 }
  0x2e   : > { %p840_p12 = por %p975_p10, %p36_p1  ;;  %s479_s12 = sshll.u32 %s198_s10, 3 }
  0x2f   : > { %s849_s14 = scalar_lea.hbm %s962_s0, %s480_s11  ;;  %s202_s28 = scalar_lea.vmem [#allocation2], %s479_s12 }
  0x30   : > { %s209_s6 = sshll.u32 %s202_s28, 4  ;;  %p851_p11 = pnand %p536_p6, %p38_p8  ;;  %s855_s6 = int_to_ptr.vmem [resolvable:$true] %s209_s6 }
  0x31   : > { %s199_s15 = scalar_lea.sflag [#allocation3], %s198_s10  ;;  %s609_s16 = scalar_lea.hbm %s849_s14, 128 }
  0x32   : > { %p610_p13 = scmp.ne.s32.totalorder %s849_s14, %s609_s16  ;;  %p611_p0 = pneg %p851_p11 }
  0x33   : > { %s614_s27 = scalar_lea.hbm %s962_s0, 256  ;;  %p615_p7 = scmp.lt.u32.totalorder %s849_s14, %s962_s0 }
  0x34   : > { %p612_p3 = pnand %p611_p0, %p610_p13  ;;  %p616_p9 = scmp.lt.u32.totalorder %s614_s27, %s609_s16 }
  0x35   : > { %p618_p1 = scmp.lt.u32.totalorder %s609_s16, %s849_s14 }
  0x36   : > { %p613_p5 = pneg %p612_p3  ;;  %p617_p2 = por %p616_p9, %p615_p7 }
  0x38   : > { %p619_p4 = por %p618_p1, %p617_p2 }
  0x3a   : > { %p620_p6 = pnand %p619_p4, %p613_p5 }
  0x3c   : > { %623 = shalt.err (!%p620_p6)
}
  0x3d   : > { %s624_s10 = scalar_lea.vmem %s855_s6, 128  ;;  %s714_s29 = smov [#allocation2]  }
  0x3e   : > { %p625_p8 = scmp.ne.s32.totalorder %s855_s6, %s624_s10  ;;  %s629_s13 = sshll.u32 %s714_s29, 4  ;;  %s630_s13 = int_to_ptr.vmem [resolvable:$false] %s629_s13 }
  0x3f   : > { %s631_s28 = scalar_lea.vmem %s630_s13, 256  ;;  %p632_p3 = scmp.lt.s32.totalorder %s855_s6, %s630_s13 }
  0x40   : > { %p627_p10 = pnand %p625_p8, %p611_p0  ;;  %p633_p7 = scmp.lt.s32.totalorder %s631_s28, %s624_s10 }
  0x42   : > { %p628_p13 = pneg %p627_p10  ;;  %p634_p9 = por %p633_p7, %p632_p3 }
  0x44   : > { %p635_p2 = pnand %p634_p9, %p628_p13 }
  0x46   : > { %638 = shalt.err (!%p635_p2)
}
  0x47   : > { %530 = dma.hbm_to_vmem [thread:$0]  (!%p851_p11), %s849_s14, 128, %s855_s6, %s199_s15  }
  0x48   : > { %p978_p5 = scmp.ne.s32.totalorder %s973_s26, 0 }
  0x49   : > { %s885_s16 = sand.u32 (!%p978_p5), 1, %s701_s19   ;;  %p979_p0 = scmp.ne.s32.totalorder (!%p978_p5), %s971_s24, 0 }
  0x4a   : > { %218 = sbr.rel (%p978_p5) target bundleno = 514 (0x202), region = 40  ;;  %s482_s17 = sshll.u32 (!%p978_p5), %s885_s16, 3 }
  0x4b   : > { %s221_s23 = scalar_lea.sflag (!%p978_p5), [#allocation3], %s885_s16  ;;  %s224_s27 = scalar_lea.vmem (!%p978_p5), [#allocation2], %s482_s17 }
  0x51   : > { %684 = dma.done.wait (%p979_p0), %s221_s23, 128  }
  0x52   : > { %686 = vsyncadd (%p979_p0), %s221_s23, 4294967168  ;;  %p980_p11 = scmp.eq.s32.totalorder %s770_s22, 0 }
  0x54   : > { %688 = dma.done.wait (%p980_p11), [#allocation6], 512   ;;  %p981_p1 = pmov %p980_p11 }
  0x55   : > { %v715_v0 = vmov 0.0|0.0   ;;  %vm716_vm0 = vmmov 0   ;;  %v717_v1 = vmov 0.0   ;;  %v256_v2 = vld [vmem:[#allocation5] sm:$0xff]  ;;  %v257_v3 = vld [vmem:[#allocation5 + $0x8] sm:$0xff]  ;;  %v258_v4 = vld [vmem:[#allocation5 + $0x10] sm:$0xff] }
  0x56   : > { %690 = vsyncadd (%p981_p1), [#allocation6], 4294966784  ;;  %509 = vmatprep.subr.bf16.mxu0 %v715_v0  ;;  %506 = vmatprep.mubr.msk.f32.mxu0 %vm716_vm0, %v717_v1  ;;  %v510_v5 = vpack.c.bf16 %v257_v3, %v256_v2  ;;  %v259_v6 = vld [vmem:[#allocation5 + $0x18] sm:$0xff]  ;;  %vm267_vm1 = vcmask 261120   ;;  %v485_v9 = vld [vmem:[%s964_s2] ss:$0 sm:$0xff] }
  0x57   : > { %v513_v7 = vpack.c.bf16 %v259_v6, %v258_v4  ;;  %v255_v8 = vld [vmem:[%s224_s27] sm:$0xff]  ;;  %s490_s11 = sshll.u32 %s770_s22, 7  ;;  %s254_s12 = scalar_lea.vmem [#allocation7], %s482_s17 }
  0x58   : > { %511 = vmatpush3.bf16.msra.mxu0 %v510_v5  ;;  %v487_v29 = vld [vmem:[%s965_s3] ss:$0 sm:$0xff]  ;;  %s395_s10 = sshll.u32 %s254_s12, 4  ;;  %s917_s28 = scalar_lea.hbm %s967_s5, %s490_s11  ;;  %s919_s10 = int_to_ptr.vmem [resolvable:$true] %s395_s10 }
  0x59   : > { %512 = vmatprep.subr.bf16.mxu0 %v715_v0  ;;  %v488_v32 = vld [vmem:[%s966_s4] ss:$0 sm:$0xff]  ;;  %s382_s23 = scalar_lea.sflag [#allocation4], %s885_s16  ;;  %s639_s22 = scalar_lea.vmem %s919_s10, 128 }
  0x5a   : > { %p640_p4 = scmp.ne.s32.totalorder %s919_s10, %s639_s22  ;;  %s718_s17 = smov [#allocation7]  }
  0x5b   : > { %s643_s27 = sshll.u32 %s718_s17, 4  ;;  %s644_s27 = int_to_ptr.vmem [resolvable:$false] %s643_s27 }
  0x5c   : > { %514 = vmatpush3.bf16.msra.mxu0 %v513_v7  ;;  %p641_p6 = pnand %p640_p4, %p840_p12  ;;  %s645_s24 = scalar_lea.vmem %s644_s27, 256 }
  0x5d   : > { %p646_p10 = scmp.lt.s32.totalorder %s919_s10, %s644_s27  ;;  %p647_p13 = scmp.lt.s32.totalorder %s645_s24, %s639_s22 }
  0x5e   : > { %p642_p8 = pneg %p641_p6 }
  0x5f   : > { %507 = vmatmul.mubr.msk.f32.vlgmr.msra.gmra.mrb[0].mxu0 %vm267_vm1, %v255_v8  ;;  %p648_p3 = por %p647_p13, %p646_p10 }
  0x61   : > { %p649_p7 = pnand %p648_p3, %p642_p8 }
 0x132   : > { %v337_v10 = vpop.f32.mrb[0].mxu0 }
 0x133   : > { %v338_v11 = vadd.f32 %v485_v9, %v337_v10  ;;  %v508_v12 = vpop.f32.mrb[1].mxu0 }
 0x135   : > { %v342_v13 = vmul.f32 0.70710677, %v338_v11  ;;  %v341_v15 = vmul.f32 0.5, %v338_v11 }
 0x137   : > { %577 = verf.f32 %v342_v13 }
 0x141   : > { %v578_v14 = vpop.eup %577 }
 0x142   : > { %v344_v16 = vadd.f32 1.0, %v578_v14 }
 0x144   : > { %v345_v17 = vmul.f32 %v344_v16, %v341_v15 }
 0x146   : > { %v346_v18 = vsel %vm267_vm1, %v345_v17, 0.0  ;;  %v351_v19 = vmul.f32 %v345_v17, %v345_v17 }
 0x147   : > { %347 = vadd.xlane.f32.xlu0 %v346_v18 }
 0x148   : > { %v352_v20 = vsel %vm267_vm1, %v351_v19, 0.0 }
 0x14b   : > { %353 = vadd.xlane.f32.xlu0 %v352_v20 }
 0x1d4   : > { %v348_v21 = vpop.xlane.xlu0 %347 }
 0x1d5   : > { %v350_v22 = vmul.f32 0.03125, %v348_v21 }
 0x1d7   : > { %v356_v24 = vmul.f32 %v350_v22, %v350_v22 }
 0x1d8   : > { %v354_v23 = vpop.xlane.xlu0 %353 }
 0x1d9   : > { %v355_v25 = vmul.f32 0.03125, %v354_v23 }
 0x1db   : > { %v357_v26 = vsub.f32 %v355_v25, %v356_v24 }
 0x1dd   : > { %v358_v27 = vmax.f32 %v357_v26, 0.0 }
 0x1df   : > { %v359_v28 = vadd.f32 1e-12, %v358_v27 }
 0x1e1   : > { %579 = vrsqrt.f32 %v359_v28 }
 0x1eb   : > { %v580_v30 = vpop.eup %579 }
 0x1ec   : > { %v368_v31 = vmul.f32 %v580_v30, %v487_v29 }
 0x1ee   : > { %v370_v33 = vmul.f32 %v368_v31, %v350_v22  ;;  %v378_v35 = vmul.f32 %v368_v31, %v345_v17 }
 0x1f0   : > { %v377_v34 = vsub.f32 %v488_v32, %v370_v33 }
 0x1f2   : > { %v379_v36 = vadd.f32 %v378_v35, %v377_v34 }
 0x1f4   : > { %380 = vst.msk [vmem:[%s254_s12] sm:$0xff] %vm267_vm1, %v379_v36 }
 0x1f5   : > { %652 = shalt.err (!%p649_p7)
}
 0x1f6   : > { %s653_s16 = scalar_lea.hbm %s917_s28, 128  ;;  %s657_s6 = scalar_lea.hbm %s967_s5, 256 }
 0x1f7   : > { %p654_p9 = scmp.ne.s32.totalorder %s917_s28, %s653_s16  ;;  %p658_p0 = scmp.lt.u32.totalorder %s917_s28, %s967_s5 }
 0x1f8   : > { %p659_p11 = scmp.lt.u32.totalorder %s657_s6, %s653_s16  ;;  %p661_p4 = scmp.lt.u32.totalorder %s653_s16, %s917_s28 }
 0x1f9   : > { %p655_p2 = pnand %p654_p9, %p840_p12 }
 0x1fa   : > { %p660_p1 = por %p659_p11, %p658_p0 }
 0x1fb   : > { %p656_p5 = pneg %p655_p2 }
 0x1fc   : > { %p662_p6 = por %p661_p4, %p660_p1 }
 0x1fe   : > { %p663_p8 = pnand %p662_p6, %p656_p5 }
 0x200   : > { %666 = shalt.err (!%p663_p8)
}
 0x201   : > { %521 = dma.vmem_to_hbm [thread:$0]  (%p840_p12), %s919_s10, 128, %s917_s28, %s382_s23  }
 0x202 PF: > { %s407_s11 = sand.u32 1, %s697_s18   ;;  %p982_p10 = scmp.ne.s32.totalorder %s972_s25, 0 }
 0x203   : > { %p983_p13 = scmp.ge.s32.totalorder %s709_s21, 2  ;;  %s408_s12 = scalar_lea.sflag [#allocation4], %s407_s11 }
 0x205   : > { %p532_p3 = pnand %p983_p13, %p982_p10 }
 0x207   : > { %692 = dma.done.wait (!%p532_p3), %s408_s12, 128  }
 0x208   : > { %694 = vsyncadd (!%p532_p3), %s408_s12, 4294967168  ;;  %p19_p7 = scmp.ge.s32.totalorder %s805_s30, 4   ;;  %s984_s18 = smov %s701_s19 }
 0x209   : > { %s985_s19 = smov %s705_s20  ;;  %s986_s20 = smov %s836_s8 }
 0x20a   : > { %s987_s21 = smov %s805_s30  ;;  %21 = sbr.rel (!%p19_p7) target bundleno = 6 (0x6), region = 89 }
 0x211   :  { %413 = vsyncpa [#allocation3], 1 }
 0x212   :  { %415 = vsyncpa [#allocation3 + $0x1], 1 }
 0x213   :  { %416 = vsyncpa [#allocation6], 1 }
 0x214   :  { %417 = vsyncpa [#allocation4], 1 }
 0x215   :  { %419 = vsyncpa [#allocation4 + $0x1], 1 }

</bundles_post_ra>
